<compile_context>
chip_gen: v5e
topology: v5e:2x2
jax: 0.10.0
libtpu: 0.0.40
codegen_flags: <defaults>
</compile_context>

<pallas_src>
import jax
import jax.numpy as jnp
from jax.experimental import pallas as pl
from jax.experimental.pallas import tpu as pltpu

LANE = 128


def head_kernel(x_ref,
                w1_ref, b1_ref, a1_ref,
                w2_ref, b2_ref, a2_ref,
                wf_ref, bf_ref,
                o_ref):
    """Fused MLP head on one (tm, 768) batch tile. Weights resident in VMEM, alphas in SMEM."""
    # In-kernel bf16 cast of the streamed f32 tile (VPU cast hides under the MXU).
    x = x_ref[...].astype(jnp.bfloat16)          # (tm, 768)
    a1 = a1_ref[0, 0]                            # SMEM scalar (PReLU shared alpha)
    a2 = a2_ref[0, 0]

    # Linear(768, 256) + PReLU  (bf16 MXU, f32 accumulate, PReLU in f32)
    h1 = jnp.dot(x, w1_ref[...], preferred_element_type=jnp.float32) + b1_ref[...]
    h1 = jnp.where(h1 >= 0, h1, a1 * h1).astype(jnp.bfloat16)

    # Linear(256, 128) + PReLU
    h2 = jnp.dot(h1, w2_ref[...], preferred_element_type=jnp.float32) + b2_ref[...]
    h2 = jnp.where(h2 >= 0, h2, a2 * h2).astype(jnp.bfloat16)

    # Fused Linear(128, output_size) @ Linear(output_size, 2), weight zero-padded to 128
    # lanes so the MXU matmul is lane-dense; only the first 2 lanes are stored.
    logits = jnp.dot(h2, wf_ref[...], preferred_element_type=jnp.float32) + bf_ref[...]
    o_ref[...] = logits[:, :2].astype(o_ref.dtype)


def _pick_tm(B):
    """Tile rows: multiple of 8, <= 1024, minimal padding waste, >= 2 steps when B >= 16."""
    if B <= 8:
        return 8
    n_steps = max(2, pl.cdiv(B, 1024))
    tm = pl.cdiv(B, n_steps)
    tm = ((tm + 7) // 8) * 8
    return max(8, min(1024, tm))


def model_head(x, params, *, tm=None):
    """x: (B, 768) pooled BERT hidden state (f32). Returns (B, 2) f32 logits."""
    (w1, b1, a1, w2, b2, a2, w3, b3, wc, bc) = params
    B = x.shape[0]

    if tm is None:
        tm = _pick_tm(B)
    else:
        tm = max(8, ((tm + 7) // 8) * 8)
    grid = (pl.cdiv(B, tm),)

    # bf16 matmul weights; biases stay f32 (added on the f32 accumulator).
    w1b = w1.astype(jnp.bfloat16)
    w2b = w2.astype(jnp.bfloat16)
    # Fold classifier into the last hidden linear (exact in f32: no nonlinearity between).
    wf = w3 @ wc                                  # (128, 2) f32
    bf = b3 @ wc + bc                             # (1, 2)  f32
    wf_pad = jnp.zeros((128, LANE), jnp.bfloat16).at[:, :2].set(wf.astype(jnp.bfloat16))
    bf_pad = jnp.zeros((1, LANE), jnp.float32).at[:, :2].set(bf)

    const2 = lambda i: (0, 0)
    resident = lambda shape: pl.BlockSpec(shape, const2)          # same block every step -> stays in VMEM
    smem = pl.BlockSpec(memory_space=pltpu.MemorySpace.SMEM)       # whole (1,1) alpha in SMEM

    flops = 2 * B * (768 * 256 + 256 * 128 + 128 * LANE)
    bytes_accessed = (x.size * 4
                      + (w1b.size + w2b.size + wf_pad.size) * 2
                      + (b1.size + b2.size + bf_pad.size) * 4
                      + B * 2 * 4)

    out = pl.pallas_call(
        head_kernel,
        out_shape=jax.ShapeDtypeStruct((B, 2), jnp.float32),
        grid=grid,
        in_specs=[
            pl.BlockSpec((tm, 768), lambda i: (i, 0)),             # x: streamed f32 batch tiles
            resident((768, 256)), resident((1, 256)), smem,        # w1, b1, alpha1
            resident((256, 128)), resident((1, 128)), smem,        # w2, b2, alpha2
            resident((128, LANE)), resident((1, LANE)),            # fused W (padded), fused b (padded)
        ],
        out_specs=pl.BlockSpec((tm, 2), lambda i: (i, 0)),
        compiler_params=pltpu.CompilerParams(
            dimension_semantics=("parallel",),
            vmem_limit_bytes=32 * 1024 * 1024,
        ),
        cost_estimate=pl.CostEstimate(flops=flops, transcendentals=0,
                                      bytes_accessed=bytes_accessed),
    )(x, w1b, b1, a1, w2b, b2, a2, wf_pad, bf_pad)

    return out


def init_params(key, output_size):
    ks = jax.random.split(key, 8)

    def linear(kw, kb, fan_in, fan_out):
        # torch.nn.Linear default init: U(-1/sqrt(fan_in), 1/sqrt(fan_in))
        lim = 1.0 / jnp.sqrt(jnp.float32(fan_in))
        w = jax.random.uniform(kw, (fan_in, fan_out), jnp.float32, -lim, lim)
        b = jax.random.uniform(kb, (1, fan_out), jnp.float32, -lim, lim)
        return w, b

    w1, b1 = linear(ks[0], ks[1], 768, 256)
    w2, b2 = linear(ks[2], ks[3], 256, 128)
    w3, b3 = linear(ks[4], ks[5], 128, output_size)
    wc, bc = linear(ks[6], ks[7], output_size, 2)
    a1 = jnp.full((1, 1), 0.25, jnp.float32)   # PReLU default shared alpha
    a2 = jnp.full((1, 1), 0.25, jnp.float32)
    return (w1, b1, a1, w2, b2, a2, w3, b3, wc, bc)


def reference(x, params):
    """Pure-JAX reference with the same bf16-operand / f32-accumulate / fused-classifier numerics."""
    (w1, b1, a1, w2, b2, a2, w3, b3, wc, bc) = params
    bf16 = jnp.bfloat16
    prelu = lambda h, a: jnp.where(h >= 0, h, a[0, 0] * h)
    h = jnp.dot(x.astype(bf16), w1.astype(bf16), preferred_element_type=jnp.float32) + b1
    h = prelu(h, a1).astype(bf16)
    h = jnp.dot(h, w2.astype(bf16), preferred_element_type=jnp.float32) + b2
    h = prelu(h, a2).astype(bf16)
    wf = (w3 @ wc).astype(bf16)
    bfb = b3 @ wc + bc
    return jnp.dot(h, wf, preferred_element_type=jnp.float32) + bfb


def reference_f32(x, params):
    """All-f32 reference matching the PyTorch module layer-by-layer (informational)."""
    (w1, b1, a1, w2, b2, a2, w3, b3, wc, bc) = params
    prelu = lambda h, a: jnp.where(h >= 0, h, a[0, 0] * h)
    h = prelu(x @ w1 + b1, a1)
    h = prelu(h @ w2 + b2, a2)
    h = h @ w3 + b3
    return h @ wc + bc


if __name__ == "__main__":
    B = 8
    OUTPUT_SIZE = 128

    key = jax.random.PRNGKey(0)
    kx, kp = jax.random.split(key)
    # Stand-in for the BERT pooled output hidden_state (B, 768).
    x = jax.random.normal(kx, (B, 768), jnp.float32)
    params = init_params(kp, OUTPUT_SIZE)

    out = jax.block_until_ready(model_head(x, params))
    ref = reference(x, params)
    ref32 = reference_f32(x, params)

    assert out.shape == (B, 2), out.shape
    err = float(jnp.max(jnp.abs(out - ref)))
    err32 = float(jnp.max(jnp.abs(out - ref32)))
    assert jnp.allclose(out, ref, atol=2e-3, rtol=2e-3), (err, err32)
    print("KERNEL_OK")
</pallas_src>

<mosaic_0001>
module attributes {stable_mosaic.version = 11 : i64} {
  func.func @head_kernel(%arg0: i32, %arg1: memref<8x768xf32, #tpu.memory_space<vmem>>, %arg2: memref<768x256xbf16, #tpu.memory_space<vmem>>, %arg3: memref<1x256xf32, #tpu.memory_space<vmem>>, %arg4: memref<1x1xf32, #tpu.memory_space<smem>>, %arg5: memref<256x128xbf16, #tpu.memory_space<vmem>>, %arg6: memref<1x128xf32, #tpu.memory_space<vmem>>, %arg7: memref<1x1xf32, #tpu.memory_space<smem>>, %arg8: memref<128x128xbf16, #tpu.memory_space<vmem>>, %arg9: memref<1x128xf32, #tpu.memory_space<vmem>>, %arg10: memref<8x2xf32, #tpu.memory_space<vmem>>) attributes {dimension_semantics = [#tpu.dimension_semantics<parallel>], iteration_bounds = array<i64: 1>, scalar_prefetch = 0 : i64, scratch_operands = 0 : i64, tpu.core_type = #tpu.core_type<tc>, window_params = [{transform_indices = @transform_0, window_bounds = array<i64: 8, 768>}, {pipeline_mode = #tpu.pipeline_mode<synchronous>, transform_indices = @transform_1, window_bounds = array<i64: 768, 256>}, {pipeline_mode = #tpu.pipeline_mode<synchronous>, transform_indices = @transform_2, window_bounds = array<i64: 1, 256>}, {transform_indices = @transform_3, window_bounds = array<i64: 1, 1>}, {pipeline_mode = #tpu.pipeline_mode<synchronous>, transform_indices = @transform_4, window_bounds = array<i64: 256, 128>}, {pipeline_mode = #tpu.pipeline_mode<synchronous>, transform_indices = @transform_5, window_bounds = array<i64: 1, 128>}, {transform_indices = @transform_6, window_bounds = array<i64: 1, 1>}, {pipeline_mode = #tpu.pipeline_mode<synchronous>, transform_indices = @transform_7, window_bounds = array<i64: 128, 128>}, {pipeline_mode = #tpu.pipeline_mode<synchronous>, transform_indices = @transform_8, window_bounds = array<i64: 1, 128>}, {transform_indices = @transform_9, window_bounds = array<i64: 8, 2>}]} {
    %c0 = arith.constant 0 : index
    %c0_0 = arith.constant 0 : index
    %0 = vector.load %arg1[%c0, %c0_0] : memref<8x768xf32, #tpu.memory_space<vmem>>, vector<8x768xf32>
    %1 = arith.truncf %0 : vector<8x768xf32> to vector<8x768xbf16>
    %c0_1 = arith.constant 0 : index
    %c0_2 = arith.constant 0 : index
    %2 = memref.load %arg4[%c0_1, %c0_2] : memref<1x1xf32, #tpu.memory_space<smem>>
    %c0_3 = arith.constant 0 : index
    %c0_4 = arith.constant 0 : index
    %3 = memref.load %arg7[%c0_3, %c0_4] : memref<1x1xf32, #tpu.memory_space<smem>>
    %c0_5 = arith.constant 0 : index
    %c0_6 = arith.constant 0 : index
    %4 = vector.load %arg2[%c0_5, %c0_6] : memref<768x256xbf16, #tpu.memory_space<vmem>>, vector<768x256xbf16>
    %cst = arith.constant dense<0.000000e+00> : vector<8x256xf32>
    %5 = tpu.matmul %1, %4, %cst {dimension_numbers = #tpu.dot_dimension_numbers<[1], [0], [0], [1], [0, 0, 1, 1], [], []>} : vector<8x768xbf16>, vector<768x256xbf16>, vector<8x256xf32> -> vector<8x256xf32>
    %c0_7 = arith.constant 0 : index
    %c0_8 = arith.constant 0 : index
    %6 = vector.load %arg3[%c0_7, %c0_8] : memref<1x256xf32, #tpu.memory_space<vmem>>, vector<1x256xf32>
    %7 = vector.broadcast %6 : vector<1x256xf32> to vector<8x256xf32>
    %8 = arith.addf %5, %7 : vector<8x256xf32>
    %cst_9 = arith.constant 0.000000e+00 : f32
    %9 = vector.broadcast %cst_9 : f32 to vector<8x256xf32>
    %10 = arith.cmpf oge, %8, %9 : vector<8x256xf32>
    %11 = vector.broadcast %2 : f32 to vector<8x256xf32>
    %12 = arith.mulf %11, %8 : vector<8x256xf32>
    %13 = arith.select %10, %8, %12 : vector<8x256xi1>, vector<8x256xf32>
    %14 = arith.truncf %13 : vector<8x256xf32> to vector<8x256xbf16>
    %c0_10 = arith.constant 0 : index
    %c0_11 = arith.constant 0 : index
    %15 = vector.load %arg5[%c0_10, %c0_11] : memref<256x128xbf16, #tpu.memory_space<vmem>>, vector<256x128xbf16>
    %cst_12 = arith.constant dense<0.000000e+00> : vector<8x128xf32>
    %16 = tpu.matmul %14, %15, %cst_12 {dimension_numbers = #tpu.dot_dimension_numbers<[1], [0], [0], [1], [0, 0, 1, 1], [], []>} : vector<8x256xbf16>, vector<256x128xbf16>, vector<8x128xf32> -> vector<8x128xf32>
    %c0_13 = arith.constant 0 : index
    %c0_14 = arith.constant 0 : index
    %17 = vector.load %arg6[%c0_13, %c0_14] : memref<1x128xf32, #tpu.memory_space<vmem>>, vector<1x128xf32>
    %18 = vector.broadcast %17 : vector<1x128xf32> to vector<8x128xf32>
    %19 = arith.addf %16, %18 : vector<8x128xf32>
    %cst_15 = arith.constant 0.000000e+00 : f32
    %20 = vector.broadcast %cst_15 : f32 to vector<8x128xf32>
    %21 = arith.cmpf oge, %19, %20 : vector<8x128xf32>
    %22 = vector.broadcast %3 : f32 to vector<8x128xf32>
    %23 = arith.mulf %22, %19 : vector<8x128xf32>
    %24 = arith.select %21, %19, %23 : vector<8x128xi1>, vector<8x128xf32>
    %25 = arith.truncf %24 : vector<8x128xf32> to vector<8x128xbf16>
    %c0_16 = arith.constant 0 : index
    %c0_17 = arith.constant 0 : index
    %26 = vector.load %arg8[%c0_16, %c0_17] : memref<128x128xbf16, #tpu.memory_space<vmem>>, vector<128x128xbf16>
    %cst_18 = arith.constant dense<0.000000e+00> : vector<8x128xf32>
    %27 = tpu.matmul %25, %26, %cst_18 {dimension_numbers = #tpu.dot_dimension_numbers<[1], [0], [0], [1], [0, 0, 1, 1], [], []>} : vector<8x128xbf16>, vector<128x128xbf16>, vector<8x128xf32> -> vector<8x128xf32>
    %c0_19 = arith.constant 0 : index
    %c0_20 = arith.constant 0 : index
    %28 = vector.load %arg9[%c0_19, %c0_20] : memref<1x128xf32, #tpu.memory_space<vmem>>, vector<1x128xf32>
    %29 = vector.broadcast %28 : vector<1x128xf32> to vector<8x128xf32>
    %30 = arith.addf %27, %29 : vector<8x128xf32>
    %31 = vector.extract_strided_slice %30 {offsets = [0, 0], sizes = [8, 2], strides = [1, 1]} : vector<8x128xf32> to vector<8x2xf32>
    %c0_21 = arith.constant 0 : index
    %c0_22 = arith.constant 0 : index
    %32 = vector.load %arg10[%c0_21, %c0_22] : memref<8x2xf32, #tpu.memory_space<vmem>>, vector<8x2xf32>
    tpu.vector_store %arg10[%c0_21, %c0_22], %31 {strides = array<i32>} : memref<8x2xf32, #tpu.memory_space<vmem>>, vector<8x2xf32>,
    return
  }
  func.func @transform_0(%arg0: i32) -> (i32, i32) {
    %c0_i32 = arith.constant 0 : i32
    %c0_i32_0 = arith.constant 0 : i32
    return %arg0, %c0_i32 : i32, i32
  }
  func.func @transform_1(%arg0: i32) -> (i32, i32) {
    %c0_i32 = arith.constant 0 : i32
    %c0_i32_0 = arith.constant 0 : i32
    %c0_i32_1 = arith.constant 0 : i32
    return %c0_i32, %c0_i32_0 : i32, i32
  }
  func.func @transform_2(%arg0: i32) -> (i32, i32) {
    %c0_i32 = arith.constant 0 : i32
    %c0_i32_0 = arith.constant 0 : i32
    %c0_i32_1 = arith.constant 0 : i32
    return %c0_i32, %c0_i32_0 : i32, i32
  }
  func.func @transform_3(%arg0: i32) -> (i32, i32) {
    %c0_i32 = arith.constant 0 : i32
    %c0_i32_0 = arith.constant 0 : i32
    %c0_i32_1 = arith.constant 0 : i32
    return %c0_i32, %c0_i32_0 : i32, i32
  }
  func.func @transform_4(%arg0: i32) -> (i32, i32) {
    %c0_i32 = arith.constant 0 : i32
    %c0_i32_0 = arith.constant 0 : i32
    %c0_i32_1 = arith.constant 0 : i32
    return %c0_i32, %c0_i32_0 : i32, i32
  }
  func.func @transform_5(%arg0: i32) -> (i32, i32) {
    %c0_i32 = arith.constant 0 : i32
    %c0_i32_0 = arith.constant 0 : i32
    %c0_i32_1 = arith.constant 0 : i32
    return %c0_i32, %c0_i32_0 : i32, i32
  }
  func.func @transform_6(%arg0: i32) -> (i32, i32) {
    %c0_i32 = arith.constant 0 : i32
    %c0_i32_0 = arith.constant 0 : i32
    %c0_i32_1 = arith.constant 0 : i32
    return %c0_i32, %c0_i32_0 : i32, i32
  }
  func.func @transform_7(%arg0: i32) -> (i32, i32) {
    %c0_i32 = arith.constant 0 : i32
    %c0_i32_0 = arith.constant 0 : i32
    %c0_i32_1 = arith.constant 0 : i32
    return %c0_i32, %c0_i32_0 : i32, i32
  }
  func.func @transform_8(%arg0: i32) -> (i32, i32) {
    %c0_i32 = arith.constant 0 : i32
    %c0_i32_0 = arith.constant 0 : i32
    %c0_i32_1 = arith.constant 0 : i32
    return %c0_i32, %c0_i32_0 : i32, i32
  }
  func.func @transform_9(%arg0: i32) -> (i32, i32) {
    %c0_i32 = arith.constant 0 : i32
    %c0_i32_0 = arith.constant 0 : i32
    return %arg0, %c0_i32 : i32, i32
  }
}

</mosaic_0001>

<bundles_post_ra>
// kernel: tpu_custom_call.1
= control target key start
LH: loop header
LB: loop body
LE: loop exit
PB: predicated region body
PF: predicated region fallthrough
CT: control target
= control target key end

     0   :  { %16 = vsyncpa [#allocation5], 0  ;;  %s1933_s0 = inlined_call_operand.hbm [shape: f32[8,768], index: 0, kind: input, shape index: {}]   ;;  %s1934_s1 = inlined_call_operand.hbm [shape: bf16[768,256], index: 1, kind: input, shape index: {}]   ;;  %s1935_s2 = inlined_call_operand.vmem [shape: f32[1,256], index: 2, kind: input, shape index: {}]   ;;  %s1936_s3 = inlined_call_operand.<no memory space> [shape: f32[1,1], index: 3, kind: input, shape index: {}]   ;;  %s1937_s4 = inlined_call_operand.hbm [shape: bf16[256,128], index: 4, kind: input, shape index: {}]   ;;  %s1938_s5 = inlined_call_operand.vmem [shape: f32[1,128], index: 5, kind: input, shape index: {}]   ;;  %s1939_s6 = inlined_call_operand.<no memory space> [shape: f32[1,1], index: 6, kind: input, shape index: {}]   ;;  %s1940_s7 = inlined_call_operand.hbm [shape: bf16[128,128], index: 7, kind: input, shape index: {}]   ;;  %s1941_s8 = inlined_call_operand.vmem [shape: f32[1,128], index: 8, kind: input, shape index: {}]   ;;  %s1942_s9 = inlined_call_operand.vmem [shape: f32[8,2], index: 9, kind: output, shape index: {}]  }
   0x1   :  { %17 = vsyncpa [#allocation7], 0  ;;  %s34_s11 = sshll.u32 %s1934_s1, 4  ;;  %s35_s11 = int_to_ptr.hbm [resolvable:$true] %s34_s11 }
   0x2   :  { %18 = vsyncpa [#allocation10], 0  ;;  %s1821_s12 = smov [#allocation6]   ;;  %s24_s16 = sshll.u32 %s1933_s0, 4  ;;  %s25_s16 = int_to_ptr.hbm [resolvable:$true] %s24_s16 }
   0x3   :  { %s36_s13 = sshll.u32 %s1821_s12, 4  ;;  %s1822_s17 = smov 128   ;;  %s37_s13 = int_to_ptr.vmem [resolvable:$true] %s36_s13 }
   0x4   :  { %s1823_s18 = smov 8   ;;  %s1824_s19 = smov [#allocation4]  }
   0x5   :  { %42 = dma.hbm_to_vmem [thread:$0]  %s35_s11, 12288, %s37_s13, [#allocation7], %s1822_s17, %s1822_s17, %s1823_s18  }
   0x6   :  { %s26_s20 = sshll.u32 %s1824_s19, 4  ;;  %s51_s23 = sshll.u32 %s1937_s4, 4  ;;  %s27_s20 = int_to_ptr.vmem [resolvable:$true] %s26_s20  ;;  %s52_s23 = int_to_ptr.hbm [resolvable:$true] %s51_s23 }
   0x7   :  { %29 = dma.hbm_to_vmem [thread:$0]  %s25_s16, 768, %s27_s20, [#allocation5]  }
   0x8   :  { %s1825_s1 = smov [#allocation8]   ;;  %s68_s0 = sshll.u32 %s1940_s7, 4  ;;  %s69_s0 = int_to_ptr.hbm [resolvable:$true] %s68_s0 }
   0x9   :  { %s53_s24 = sshll.u32 %s1825_s1, 4  ;;  %s1826_s27 = smov 64   ;;  %s54_s24 = int_to_ptr.vmem [resolvable:$true] %s53_s24 }
   0xa   :  { %s1827_s28 = smov 4   ;;  %s1828_s29 = smov [#allocation9]  }
   0xb   :  { %59 = dma.hbm_to_vmem [thread:$0]  %s52_s23, 2048, %s54_s24, [#allocation7], %s1826_s27, %s1826_s27, %s1827_s28  }
   0xc   :  { %s70_s30 = sshll.u32 %s1828_s29, 4  ;;  %s71_s30 = int_to_ptr.vmem [resolvable:$true] %s70_s30 }
   0xd   :  { %76 = dma.hbm_to_vmem [thread:$0]  %s69_s0, 1024, %s71_s30, [#allocation10], %s1826_s27, %s1826_s27, %s1827_s28  }
   0xe   :  { %1815 = dma.done.wait [#allocation5], 768  }
   0xf   :  { %1816 = vsyncadd [#allocation5], 4294966528 }
  0x10   :  { %1817 = dma.done.wait [#allocation7], 14336  }
  0x11   :  { %1818 = vsyncadd [#allocation7], 4294952960 }
  0x12   :  { %1819 = dma.done.wait [#allocation10], 1024  }
  0x13   :  { %1820 = vsyncadd [#allocation10], 4294966272  ;;  %v1167_v0 = vld [vmem:[#allocation6 + $0x70] sm:$0xf]  ;;  %v1604_v1 = vld [vmem:[#allocation6 + $0x74] sm:$0xf0] }
  0x14   :  { %v1231_v2 = vld [vmem:[#allocation6 + $0xf0] sm:$0xf]  ;;  %v1168_v3 = vor.u32 %v1604_v1, %v1167_v0  ;;  %v1620_v4 = vld [vmem:[#allocation6 + $0xf4] sm:$0xf0]  ;;  %v1159_v11 = vld [vmem:[#allocation6 + $0x60] sm:$0xf] }
  0x15   :  { %v1295_v5 = vld [vmem:[#allocation6 + $0x170] sm:$0xf]  ;;  %v1636_v6 = vld [vmem:[#allocation6 + $0x174] sm:$0xf0]  ;;  %v1232_v7 = vor.u32 %v1620_v4, %v1231_v2  ;;  %v1602_v13 = vld [vmem:[#allocation6 + $0x64] sm:$0xf0] }
  0x16   :  { %v1296_v8 = vor.u32 %v1636_v6, %v1295_v5  ;;  %v1359_v9 = vld [vmem:[#allocation6 + $0x1f0] sm:$0xf]  ;;  %v1652_v10 = vld [vmem:[#allocation6 + $0x1f4] sm:$0xf0]  ;;  %691 = vmatpush.bf16.msra.mxu0 %v1168_v3  ;;  %v1223_v14 = vld [vmem:[#allocation6 + $0xe0] sm:$0xf]  ;;  %v1160_v16 = vor.u32 %v1602_v13, %v1159_v11 }
  0x17   :  { %v1360_v12 = vor.u32 %v1652_v10, %v1359_v9  ;;  %v1618_v15 = vld [vmem:[#allocation6 + $0xe4] sm:$0xf0]  ;;  %704 = vmatpush.bf16.msra.mxu1 %v1232_v7  ;;  %v1287_v18 = vld [vmem:[#allocation6 + $0x160] sm:$0xf]  ;;  %v1151_v23 = vld [vmem:[#allocation6 + $0x50] sm:$0xf] }
  0x18   :  { %717 = vmatpush.bf16.msra.mxu2 %v1296_v8  ;;  %v1224_v17 = vor.u32 %v1618_v15, %v1223_v14  ;;  %v1634_v19 = vld [vmem:[#allocation6 + $0x164] sm:$0xf0]  ;;  %v1351_v20 = vld [vmem:[#allocation6 + $0x1e0] sm:$0xf]  ;;  %v1600_v24 = vld [vmem:[#allocation6 + $0x54] sm:$0xf0] }
  0x19   :  { %730 = vmatpush.bf16.msra.mxu3 %v1360_v12  ;;  %v1288_v21 = vor.u32 %v1634_v19, %v1287_v18  ;;  %v1650_v22 = vld [vmem:[#allocation6 + $0x1e4] sm:$0xf0]  ;;  %v1215_v26 = vld [vmem:[#allocation6 + $0xd0] sm:$0xf]  ;;  %v1616_v27 = vld [vmem:[#allocation6 + $0xd4] sm:$0xf0]  ;;  %v1152_v29 = vor.u32 %v1600_v24, %v1151_v23 }
  0x1a   :  { %v1352_v25 = vor.u32 %v1650_v22, %v1351_v20  ;;  %v1279_v28 = vld [vmem:[#allocation6 + $0x150] sm:$0xf]  ;;  %692 = vmatpush.bf16.msra.mxu0 %v1160_v16  ;;  %v1632_v30 = vld [vmem:[#allocation6 + $0x154] sm:$0xf0]  ;;  %v1216_v33 = vor.u32 %v1616_v27, %v1215_v26  ;;  %v1143_v35 = vld [vmem:[#allocation6 + $0x40] sm:$0xf] }
  0x1b   :  { %v1343_v31 = vld [vmem:[#allocation6 + $0x1d0] sm:$0xf]  ;;  %v1648_v32 = vld [vmem:[#allocation6 + $0x1d4] sm:$0xf0]  ;;  %705 = vmatpush.bf16.msra.mxu1 %v1224_v17  ;;  %v1280_v34 = vor.u32 %v1632_v30, %v1279_v28  ;;  %v1598_v36 = vld [vmem:[#allocation6 + $0x44] sm:$0xf0] }
  0x1c   :  { %718 = vmatpush.bf16.msra.mxu2 %v1288_v21  ;;  %v1207_v37 = vld [vmem:[#allocation6 + $0xc0] sm:$0xf]  ;;  %v1344_v38 = vor.u32 %v1648_v32, %v1343_v31  ;;  %v1614_v39 = vld [vmem:[#allocation6 + $0xc4] sm:$0xf0]  ;;  %v1144_v44 = vor.u32 %v1598_v36, %v1143_v35  ;;  %v1135_v47 = vld [vmem:[#allocation6 + $0x30] sm:$0xf] }
  0x1d   :  { %731 = vmatpush.bf16.msra.mxu3 %v1352_v25  ;;  %v1271_v40 = vld [vmem:[#allocation6 + $0x140] sm:$0xf]  ;;  %v1630_v41 = vld [vmem:[#allocation6 + $0x144] sm:$0xf0]  ;;  %v1208_v45 = vor.u32 %v1614_v39, %v1207_v37  ;;  %v1596_v48 = vld [vmem:[#allocation6 + $0x34] sm:$0xf0] }
  0x1e   :  { %v1335_v42 = vld [vmem:[#allocation6 + $0x1c0] sm:$0xf]  ;;  %v1646_v43 = vld [vmem:[#allocation6 + $0x1c4] sm:$0xf0]  ;;  %693 = vmatpush.bf16.msra.mxu0 %v1152_v29  ;;  %v1272_v46 = vor.u32 %v1630_v41, %v1271_v40  ;;  %v1199_v49 = vld [vmem:[#allocation6 + $0xb0] sm:$0xf]  ;;  %v1136_v56 = vor.u32 %v1596_v48, %v1135_v47 }
  0x1f   :  { %706 = vmatpush.bf16.msra.mxu1 %v1216_v33  ;;  %v1336_v50 = vor.u32 %v1646_v43, %v1335_v42  ;;  %v1612_v51 = vld [vmem:[#allocation6 + $0xb4] sm:$0xf0]  ;;  %v1263_v52 = vld [vmem:[#allocation6 + $0x130] sm:$0xf]  ;;  %v1127_v59 = vld [vmem:[#allocation6 + $0x20] sm:$0xf] }
  0x20   :  { %719 = vmatpush.bf16.msra.mxu2 %v1280_v34  ;;  %v1628_v53 = vld [vmem:[#allocation6 + $0x134] sm:$0xf0]  ;;  %v1327_v54 = vld [vmem:[#allocation6 + $0x1b0] sm:$0xf]  ;;  %v1200_v57 = vor.u32 %v1612_v51, %v1199_v49  ;;  %v1594_v60 = vld [vmem:[#allocation6 + $0x24] sm:$0xf0] }
  0x21   :  { %732 = vmatpush.bf16.msra.mxu3 %v1344_v38  ;;  %v1644_v55 = vld [vmem:[#allocation6 + $0x1b4] sm:$0xf0]  ;;  %v1264_v58 = vor.u32 %v1628_v53, %v1263_v52  ;;  %v1191_v61 = vld [vmem:[#allocation6 + $0xa0] sm:$0xf]  ;;  %v1610_v63 = vld [vmem:[#allocation6 + $0xa4] sm:$0xf0]  ;;  %v1128_v4 = vor.u32 %v1594_v60, %v1127_v59 }
  0x22   :  { %694 = vmatpush.bf16.msra.mxu0 %v1144_v44  ;;  %v1328_v62 = vor.u32 %v1644_v55, %v1327_v54  ;;  %v1255_v0 = vld [vmem:[#allocation6 + $0x120] sm:$0xf]  ;;  %v1626_v1 = vld [vmem:[#allocation6 + $0x124] sm:$0xf0]  ;;  %v1192_v5 = vor.u32 %v1610_v63, %v1191_v61  ;;  %v1119_v7 = vld [vmem:[#allocation6 + $0x10] sm:$0xf] }
  0x23   :  { %707 = vmatpush.bf16.msra.mxu1 %v1208_v45  ;;  %v1319_v2 = vld [vmem:[#allocation6 + $0x1a0] sm:$0xf]  ;;  %v1642_v3 = vld [vmem:[#allocation6 + $0x1a4] sm:$0xf0]  ;;  %v1256_v6 = vor.u32 %v1626_v1, %v1255_v0  ;;  %v1592_v8 = vld [vmem:[#allocation6 + $0x14] sm:$0xf0] }
  0x24   :  { %720 = vmatpush.bf16.msra.mxu2 %v1272_v46  ;;  %v1183_v9 = vld [vmem:[#allocation6 + $0x90] sm:$0xf]  ;;  %v1320_v10 = vor.u32 %v1642_v3, %v1319_v2  ;;  %v1608_v11 = vld [vmem:[#allocation6 + $0x94] sm:$0xf0]  ;;  %v1120_v16 = vor.u32 %v1592_v8, %v1119_v7  ;;  %v1111_v17 = vld [vmem:[#allocation6] sm:$0xf] }
  0x25   :  { %733 = vmatpush.bf16.msra.mxu3 %v1336_v50  ;;  %v1247_v12 = vld [vmem:[#allocation6 + $0x110] sm:$0xf]  ;;  %v1624_v13 = vld [vmem:[#allocation6 + $0x114] sm:$0xf0]  ;;  %v1590_v18 = vld [vmem:[#allocation6 + $0x4] sm:$0xf0]  ;;  %v1184_v19 = vor.u32 %v1608_v11, %v1183_v9 }
  0x26   :  { %695 = vmatpush.bf16.msra.mxu0 %v1136_v56  ;;  %v1311_v14 = vld [vmem:[#allocation6 + $0x190] sm:$0xf]  ;;  %v1640_v15 = vld [vmem:[#allocation6 + $0x194] sm:$0xf0]  ;;  %v1248_v20 = vor.u32 %v1624_v13, %v1247_v12  ;;  %v1175_v21 = vld [vmem:[#allocation6 + $0x80] sm:$0xf]  ;;  %v1112_v31 = vor.u32 %v1590_v18, %v1111_v17 }
  0x27   :  { %708 = vmatpush.bf16.msra.mxu1 %v1200_v57  ;;  %v1606_v22 = vld [vmem:[#allocation6 + $0x84] sm:$0xf0]  ;;  %v1239_v23 = vld [vmem:[#allocation6 + $0x100] sm:$0xf]  ;;  %v1312_v24 = vor.u32 %v1640_v15, %v1311_v14  ;;  %v1423_v28 = vld [vmem:[#allocation6 + $0x270] sm:$0xf] }
  0x28   :  { %721 = vmatpush.bf16.msra.mxu2 %v1264_v58  ;;  %v1622_v25 = vld [vmem:[#allocation6 + $0x104] sm:$0xf0]  ;;  %v1303_v26 = vld [vmem:[#allocation6 + $0x180] sm:$0xf]  ;;  %v1668_v29 = vld [vmem:[#allocation6 + $0x274] sm:$0xf0]  ;;  %v1176_v35 = vor.u32 %v1606_v22, %v1175_v21 }
  0x29   :  { %734 = vmatpush.bf16.msra.mxu3 %v1328_v62  ;;  %v1638_v27 = vld [vmem:[#allocation6 + $0x184] sm:$0xf0]  ;;  %v1487_v30 = vld [vmem:[#allocation6 + $0x2f0] sm:$0xf]  ;;  %v1684_v32 = vld [vmem:[#allocation6 + $0x2f4] sm:$0xf0]  ;;  %v1240_v36 = vor.u32 %v1622_v25, %v1239_v23  ;;  %v1424_v40 = vor.u32 %v1668_v29, %v1423_v28 }
  0x2a   :  { %696 = vmatpush.bf16.msra.mxu0 %v1128_v4  ;;  %v1603_v33 = vld [vmem:[#allocation6 + $0x74] sm:$0xf]  ;;  %v1169_v34 = vld [vmem:[#allocation6 + $0x78] sm:$0xf0]  ;;  %v1304_v39 = vor.u32 %v1638_v27, %v1303_v26  ;;  %v1488_v41 = vor.u32 %v1684_v32, %v1487_v30  ;;  %v1415_v43 = vld [vmem:[#allocation6 + $0x260] sm:$0xf] }
  0x2b   :  { %709 = vmatpush.bf16.msra.mxu1 %v1192_v5  ;;  %v1619_v37 = vld [vmem:[#allocation6 + $0xf4] sm:$0xf]  ;;  %v1233_v38 = vld [vmem:[#allocation6 + $0xf8] sm:$0xf0]  ;;  %v1172_v42 = vor.u32 %v1603_v33, %v1169_v34  ;;  %v1666_v44 = vld [vmem:[#allocation6 + $0x264] sm:$0xf0] }
  0x2c   :  { %722 = vmatpush.bf16.msra.mxu2 %v1256_v6  ;;  %v1479_v45 = vld [vmem:[#allocation6 + $0x2e0] sm:$0xf]  ;;  %v1236_v46 = vor.u32 %v1619_v37, %v1233_v38  ;;  %v1682_v47 = vld [vmem:[#allocation6 + $0x2e4] sm:$0xf0]  ;;  %v1601_v48 = vld [vmem:[#allocation6 + $0x64] sm:$0xf]  ;;  %v1416_v53 = vor.u32 %v1666_v44, %v1415_v43 }
  0x2d   :  { %735 = vmatpush.bf16.msra.mxu3 %v1320_v10  ;;  %v1161_v49 = vld [vmem:[#allocation6 + $0x68] sm:$0xf0]  ;;  %v1617_v50 = vld [vmem:[#allocation6 + $0xe4] sm:$0xf]  ;;  %v95_v52 = vld [vmem:[#allocation4] sm:$0xff]  ;;  %v1480_v57 = vor.u32 %v1682_v47, %v1479_v45  ;;  %vm1100_vm3 = vcmask 15360  }
  0x2e   :  { %697 = vmatpush.bf16.msra.mxu0 %v1120_v16  ;;  %v1225_v51 = vld [vmem:[#allocation6 + $0xe8] sm:$0xf0]  ;;  %v1407_v54 = vld [vmem:[#allocation6 + $0x250] sm:$0xf]  ;;  %v1664_v55 = vld [vmem:[#allocation6 + $0x254] sm:$0xf0]  ;;  %v1891_v56 = vpack.c.bf16 %v95_v52, %v95_v52  ;;  %v1164_v58 = vor.u32 %v1601_v48, %v1161_v49 }
  0x2f   :  { %710 = vmatpush.bf16.msra.mxu1 %v1184_v19  ;;  %v1471_v59 = vld [vmem:[#allocation6 + $0x2d0] sm:$0xf]  ;;  %v1680_v60 = vld [vmem:[#allocation6 + $0x2d4] sm:$0xf0]  ;;  %v1599_v61 = vld [vmem:[#allocation6 + $0x54] sm:$0xf]  ;;  %v1228_v62 = vor.u32 %v1617_v50, %v1225_v51  ;;  %v1408_v6 = vor.u32 %v1664_v55, %v1407_v54 }
  0x30   :  { %723 = vmatpush.bf16.msra.mxu2 %v1248_v20  ;;  %v1153_v63 = vld [vmem:[#allocation6 + $0x58] sm:$0xf0]  ;;  %v97_v1 = vld [vmem:[#allocation4 + $0x10] sm:$0xff]  ;;  %v1615_v2 = vld [vmem:[#allocation6 + $0xd4] sm:$0xf]  ;;  %v1472_v8 = vor.u32 %v1680_v60, %v1471_v59 }
  0x31   :  { %736 = vmatpush.bf16.msra.mxu3 %v1312_v24  ;;  %v96_v0 = vld [vmem:[#allocation4 + $0x8] sm:$0xff]  ;;  %v1896_v5 = vpack.c.bf16 %v97_v1, %v97_v1  ;;  %v1399_v7 = vld [vmem:[#allocation6 + $0x240] sm:$0xf]  ;;  %v1156_v9 = vor.u32 %v1599_v61, %v1153_v63  ;;  %v1662_v10 = vld [vmem:[#allocation6 + $0x244] sm:$0xf0] }
  0x32   :  { %698 = vmatpush.bf16.msra.mxu0 %v1112_v31  ;;  %v1217_v3 = vld [vmem:[#allocation6 + $0xd8] sm:$0xf0]  ;;  %v1894_v4 = vpack.c.bf16 %v96_v0, %v96_v0  ;;  %v1463_v11 = vld [vmem:[#allocation6 + $0x2c0] sm:$0xf]  ;;  %v98_v12 = vld [vmem:[#allocation4 + $0x18] sm:$0xff]  ;;  %v1400_v20 = vor.u32 %v1662_v10, %v1399_v7 }
  0x33   :  { %711 = vmatpush.bf16.msra.mxu1 %v1176_v35  ;;  %v1220_v13 = vor.u32 %v1615_v2, %v1217_v3  ;;  %v1678_v14 = vld [vmem:[#allocation6 + $0x2c4] sm:$0xf0]  ;;  %v1597_v15 = vld [vmem:[#allocation6 + $0x44] sm:$0xf]  ;;  %v1145_v16 = vld [vmem:[#allocation6 + $0x48] sm:$0xf0]  ;;  %v1899_v17 = vpack.c.bf16 %v98_v12, %v98_v12 }
  0x34   :  { %724 = vmatpush.bf16.msra.mxu2 %v1240_v36  ;;  %v1613_v18 = vld [vmem:[#allocation6 + $0xc4] sm:$0xf]  ;;  %v1209_v19 = vld [vmem:[#allocation6 + $0xc8] sm:$0xf0]  ;;  %v1464_v21 = vor.u32 %v1678_v14, %v1463_v11  ;;  %v1148_v22 = vor.u32 %v1597_v15, %v1145_v16  ;;  %v1391_v23 = vld [vmem:[#allocation6 + $0x230] sm:$0xf] }
  0x35   :  { %737 = vmatpush.bf16.msra.mxu3 %v1304_v39  ;;  %699 = vmatmul.bf16.vlgmr.msra.gmra.mxu0 %v1891_v56  ;;  %v1660_v24 = vld [vmem:[#allocation6 + $0x234] sm:$0xf0]  ;;  %v1455_v25 = vld [vmem:[#allocation6 + $0x2b0] sm:$0xf]  ;;  %v1212_v26 = vor.u32 %v1613_v18, %v1209_v19  ;;  %v1595_v28 = vld [vmem:[#allocation6 + $0x34] sm:$0xf] }
  0x36   :  { %743 = vmatpush.bf16.msrb.mxu0 %v1424_v40  ;;  %712 = vmatmul.bf16.vlgmr.msra.gmra.mxu1 %v1894_v4  ;;  %v1676_v27 = vld [vmem:[#allocation6 + $0x2b4] sm:$0xf0]  ;;  %v1137_v29 = vld [vmem:[#allocation6 + $0x38] sm:$0xf0]  ;;  %v1611_v30 = vld [vmem:[#allocation6 + $0xb4] sm:$0xf]  ;;  %v1392_v32 = vor.u32 %v1660_v24, %v1391_v23 }
  0x37   :  { %756 = vmatpush.bf16.msrb.mxu1 %v1488_v41  ;;  %725 = vmatmul.bf16.vlgmr.msra.gmra.mxu2 %v1896_v5  ;;  %v1201_v31 = vld [vmem:[#allocation6 + $0xb8] sm:$0xf0]  ;;  %v1456_v33 = vor.u32 %v1676_v27, %v1455_v25  ;;  %v1140_v34 = vor.u32 %v1595_v28, %v1137_v29  ;;  %v1383_v35 = vld [vmem:[#allocation6 + $0x220] sm:$0xf]  ;;  %v1658_v36 = vld [vmem:[#allocation6 + $0x224] sm:$0xf0] }
  0x38   :  { %769 = vmatpush.bf16.msrb.mxu2 %v1172_v42  ;;  %738 = vmatmul.bf16.vlgmr.msra.gmra.mxu3 %v1899_v17  ;;  %v1447_v37 = vld [vmem:[#allocation6 + $0x2a0] sm:$0xf]  ;;  %v1204_v38 = vor.u32 %v1611_v30, %v1201_v31  ;;  %v1674_v39 = vld [vmem:[#allocation6 + $0x2a4] sm:$0xf0]  ;;  %v1593_v40 = vld [vmem:[#allocation6 + $0x24] sm:$0xf]  ;;  %v1384_v44 = vor.u32 %v1658_v36, %v1383_v35 }
  0x39   :  { %782 = vmatpush.bf16.msrb.mxu3 %v1236_v46  ;;  %v1129_v41 = vld [vmem:[#allocation6 + $0x28] sm:$0xf0]  ;;  %v1609_v42 = vld [vmem:[#allocation6 + $0xa4] sm:$0xf]  ;;  %v1448_v45 = vor.u32 %v1674_v39, %v1447_v37  ;;  %v1375_v47 = vld [vmem:[#allocation6 + $0x210] sm:$0xf] }
  0x3a   :  { %744 = vmatpush.bf16.msrb.mxu0 %v1416_v53  ;;  %v1193_v43 = vld [vmem:[#allocation6 + $0xa8] sm:$0xf0]  ;;  %v1132_v46 = vor.u32 %v1593_v40, %v1129_v41  ;;  %v1656_v48 = vld [vmem:[#allocation6 + $0x214] sm:$0xf0]  ;;  %v1439_v49 = vld [vmem:[#allocation6 + $0x290] sm:$0xf] }
  0x3b   :  { %757 = vmatpush.bf16.msrb.mxu1 %v1480_v57  ;;  %v1196_v50 = vor.u32 %v1609_v42, %v1193_v43  ;;  %v1672_v51 = vld [vmem:[#allocation6 + $0x294] sm:$0xf0]  ;;  %v1591_v52 = vld [vmem:[#allocation6 + $0x14] sm:$0xf]  ;;  %v1121_v53 = vld [vmem:[#allocation6 + $0x18] sm:$0xf0]  ;;  %v1376_v57 = vor.u32 %v1656_v48, %v1375_v47 }
  0x3c   :  { %770 = vmatpush.bf16.msrb.mxu2 %v1164_v58  ;;  %v1607_v54 = vld [vmem:[#allocation6 + $0x94] sm:$0xf]  ;;  %v1185_v55 = vld [vmem:[#allocation6 + $0x98] sm:$0xf0]  ;;  %v1367_v58 = vld [vmem:[#allocation6 + $0x200] sm:$0xf]  ;;  %v1440_v60 = vor.u32 %v1672_v51, %v1439_v49  ;;  %v1124_v61 = vor.u32 %v1591_v52, %v1121_v53 }
  0x3d   :  { %783 = vmatpush.bf16.msrb.mxu3 %v1228_v62  ;;  %v1654_v59 = vld [vmem:[#allocation6 + $0x204] sm:$0xf0]  ;;  %v1431_v62 = vld [vmem:[#allocation6 + $0x280] sm:$0xf]  ;;  %v1589_v0 = vld [vmem:[#allocation6 + $0x4] sm:$0xf]  ;;  %v1188_v1 = vor.u32 %v1607_v54, %v1185_v55 }
  0x3e   :  { %745 = vmatpush.bf16.msrb.mxu0 %v1408_v6  ;;  %v1670_v63 = vld [vmem:[#allocation6 + $0x284] sm:$0xf0]  ;;  %v1113_v2 = vld [vmem:[#allocation6 + $0x8] sm:$0xf0]  ;;  %v1605_v3 = vld [vmem:[#allocation6 + $0x84] sm:$0xf]  ;;  %v1368_v10 = vor.u32 %v1654_v59, %v1367_v58 }
  0x3f   :  { %758 = vmatpush.bf16.msrb.mxu1 %v1472_v8  ;;  %v1177_v6 = vld [vmem:[#allocation6 + $0x88] sm:$0xf0]  ;;  %v1635_v7 = vld [vmem:[#allocation6 + $0x174] sm:$0xf]  ;;  %v1297_v8 = vld [vmem:[#allocation6 + $0x178] sm:$0xf0]  ;;  %v1432_v14 = vor.u32 %v1670_v63, %v1431_v62  ;;  %v1116_v15 = vor.u32 %v1589_v0, %v1113_v2 }
  0x40   :  { %771 = vmatpush.bf16.msrb.mxu2 %v1156_v9  ;;  %v1651_v9 = vld [vmem:[#allocation6 + $0x1f4] sm:$0xf]  ;;  %v1361_v11 = vld [vmem:[#allocation6 + $0x1f8] sm:$0xf0]  ;;  %v1633_v25 = vld [vmem:[#allocation6 + $0x164] sm:$0xf] }
  0x41   :  { %784 = vmatpush.bf16.msrb.mxu3 %v1220_v13  ;;  %v1667_v12 = vld [vmem:[#allocation6 + $0x274] sm:$0xf]  ;;  %v1425_v13 = vld [vmem:[#allocation6 + $0x278] sm:$0xf0]  ;;  %v1364_v23 = vor.u32 %v1651_v9, %v1361_v11  ;;  %v1649_v27 = vld [vmem:[#allocation6 + $0x1e4] sm:$0xf] }
  0x42   :  { %746 = vmatpush.bf16.msrb.mxu0 %v1400_v20  ;;  %v1683_v16 = vld [vmem:[#allocation6 + $0x2f4] sm:$0xf]  ;;  %v1489_v18 = vld [vmem:[#allocation6 + $0x2f8] sm:$0xf0]  ;;  %v1180_v20 = vor.u32 %v1605_v3, %v1177_v6  ;;  %v1428_v24 = vor.u32 %v1667_v12, %v1425_v13  ;;  %v1353_v30 = vld [vmem:[#allocation6 + $0x1e8] sm:$0xf0] }
  0x43   :  { %759 = vmatpush.bf16.msrb.mxu1 %v1464_v21  ;;  %v99_v19 = vld [vmem:[#allocation4 + $0x20] sm:$0xff]  ;;  %v1300_v21 = vor.u32 %v1635_v7, %v1297_v8  ;;  %v1492_v28 = vor.u32 %v1683_v16, %v1489_v18  ;;  %v1665_v31 = vld [vmem:[#allocation6 + $0x264] sm:$0xf]  ;;  %v1481_v35 = vld [vmem:[#allocation6 + $0x2e8] sm:$0xf0]  ;;  %v1356_v37 = vor.u32 %v1649_v27, %v1353_v30 }
  0x44   :  { %772 = vmatpush.bf16.msrb.mxu2 %v1148_v22  ;;  %v100_v22 = vld [vmem:[#allocation4 + $0x28] sm:$0xff]  ;;  %v1903_v29 = vpack.c.bf16 %v99_v19, %v99_v19  ;;  %v1631_v39 = vld [vmem:[#allocation6 + $0x154] sm:$0xf]  ;;  %v1629_v51 = vld [vmem:[#allocation6 + $0x144] sm:$0xf] }
  0x45   :  { %785 = vmatpush.bf16.msrb.mxu3 %v1212_v26  ;;  %v1289_v26 = vld [vmem:[#allocation6 + $0x168] sm:$0xf0]  ;;  %v1281_v40 = vld [vmem:[#allocation6 + $0x158] sm:$0xf0]  ;;  %v1647_v41 = vld [vmem:[#allocation6 + $0x1d4] sm:$0xf] }
  0x46   :  { %747 = vmatpush.bf16.msrb.mxu0 %v1392_v32  ;;  %v1417_v32 = vld [vmem:[#allocation6 + $0x268] sm:$0xf0]  ;;  %v1292_v36 = vor.u32 %v1633_v25, %v1289_v26  ;;  %v1345_v43 = vld [vmem:[#allocation6 + $0x1d8] sm:$0xf0]  ;;  %v1284_v48 = vor.u32 %v1631_v39, %v1281_v40  ;;  %v1645_v53 = vld [vmem:[#allocation6 + $0x1c4] sm:$0xf] }
  0x47   :  { %760 = vmatpush.bf16.msrb.mxu1 %v1456_v33  ;;  %v1905_v33 = vpack.c.bf16 %v100_v22, %v100_v22  ;;  %v1473_v47 = vld [vmem:[#allocation6 + $0x2d8] sm:$0xf0]  ;;  %v1348_v49 = vor.u32 %v1647_v41, %v1345_v43  ;;  %v1273_v52 = vld [vmem:[#allocation6 + $0x148] sm:$0xf0]  ;;  %v1677_v59 = vld [vmem:[#allocation6 + $0x2c4] sm:$0xf] }
  0x48   :  { %773 = vmatpush.bf16.msrb.mxu2 %v1140_v34  ;;  %v1681_v34 = vld [vmem:[#allocation6 + $0x2e4] sm:$0xf]  ;;  %v1337_v55 = vld [vmem:[#allocation6 + $0x1c8] sm:$0xf0]  ;;  %v1627_v62 = vld [vmem:[#allocation6 + $0x134] sm:$0xf] }
  0x49   :  { %786 = vmatpush.bf16.msrb.mxu3 %v1204_v38  ;;  %v1420_v38 = vor.u32 %v1665_v31, %v1417_v32  ;;  %v1484_v42 = vor.u32 %v1681_v34, %v1481_v35  ;;  %v1401_v58 = vld [vmem:[#allocation6 + $0x248] sm:$0xf0]  ;;  %v1265_v63 = vld [vmem:[#allocation6 + $0x138] sm:$0xf0]  ;;  %v1643_v0 = vld [vmem:[#allocation6 + $0x1b4] sm:$0xf] }
  0x4a   :  { %748 = vmatpush.bf16.msrb.mxu0 %v1384_v44  ;;  %v1663_v44 = vld [vmem:[#allocation6 + $0x254] sm:$0xf]  ;;  %v1329_v2 = vld [vmem:[#allocation6 + $0x1b8] sm:$0xf0]  ;;  %v1268_v9 = vor.u32 %v1627_v62, %v1265_v63  ;;  %v1625_v12 = vld [vmem:[#allocation6 + $0x124] sm:$0xf] }
  0x4b   :  { %761 = vmatpush.bf16.msrb.mxu1 %v1448_v45  ;;  %v1409_v45 = vld [vmem:[#allocation6 + $0x258] sm:$0xf0]  ;;  %v1659_v3 = vld [vmem:[#allocation6 + $0x234] sm:$0xf]  ;;  %v1257_v13 = vld [vmem:[#allocation6 + $0x128] sm:$0xf0] }
  0x4c   :  { %774 = vmatpush.bf16.msrb.mxu2 %v1132_v46  ;;  %v1679_v46 = vld [vmem:[#allocation6 + $0x2d4] sm:$0xf]  ;;  %v1393_v6 = vld [vmem:[#allocation6 + $0x238] sm:$0xf0]  ;;  %v1321_v16 = vld [vmem:[#allocation6 + $0x1a8] sm:$0xf0]  ;;  %v1260_v22 = vor.u32 %v1625_v12, %v1257_v13 }
  0x4d   :  { %787 = vmatpush.bf16.msrb.mxu3 %v1196_v50  ;;  %v1412_v50 = vor.u32 %v1663_v44, %v1409_v45  ;;  %v1476_v54 = vor.u32 %v1679_v46, %v1473_v47  ;;  %v1675_v7 = vld [vmem:[#allocation6 + $0x2b4] sm:$0xf]  ;;  %v1457_v8 = vld [vmem:[#allocation6 + $0x2b8] sm:$0xf0]  ;;  %v1396_v11 = vor.u32 %v1659_v3, %v1393_v6  ;;  %v1657_v18 = vld [vmem:[#allocation6 + $0x224] sm:$0xf] }
  0x4e   :  { %749 = vmatpush.bf16.msrb.mxu0 %v1376_v57  ;;  %v1661_v57 = vld [vmem:[#allocation6 + $0x244] sm:$0xf]  ;;  %v1385_v19 = vld [vmem:[#allocation6 + $0x228] sm:$0xf0]  ;;  %v1623_v25 = vld [vmem:[#allocation6 + $0x114] sm:$0xf] }
  0x4f   :  { %762 = vmatpush.bf16.msrb.mxu1 %v1440_v60  ;;  %v1276_v60 = vor.u32 %v1629_v51, %v1273_v52  ;;  %v1249_v26 = vld [vmem:[#allocation6 + $0x118] sm:$0xf0]  ;;  %v1639_v27 = vld [vmem:[#allocation6 + $0x194] sm:$0xf]  ;;  %v1621_v39 = vld [vmem:[#allocation6 + $0x104] sm:$0xf] }
  0x50   :  { %775 = vmatpush.bf16.msrb.mxu2 %v1124_v61  ;;  %v1340_v61 = vor.u32 %v1645_v53, %v1337_v55  ;;  %v1313_v30 = vld [vmem:[#allocation6 + $0x198] sm:$0xf0]  ;;  %v1655_v31 = vld [vmem:[#allocation6 + $0x214] sm:$0xf]  ;;  %v1241_v40 = vld [vmem:[#allocation6 + $0x108] sm:$0xf0] }
  0x51   :  { %788 = vmatpush.bf16.msrb.mxu3 %v1188_v1  ;;  %v1377_v32 = vld [vmem:[#allocation6 + $0x218] sm:$0xf0]  ;;  %v1671_v34 = vld [vmem:[#allocation6 + $0x294] sm:$0xf]  ;;  %v1637_v41 = vld [vmem:[#allocation6 + $0x184] sm:$0xf] }
  0x52   :  { %750 = vmatpush.bf16.msrb.mxu0 %v1368_v10  ;;  %v1332_v10 = vor.u32 %v1643_v0, %v1329_v2  ;;  %v1441_v35 = vld [vmem:[#allocation6 + $0x298] sm:$0xf0]  ;;  %v1305_v43 = vld [vmem:[#allocation6 + $0x188] sm:$0xf0]  ;;  %v1653_v44 = vld [vmem:[#allocation6 + $0x204] sm:$0xf] }
  0x53   :  { %763 = vmatpush.bf16.msrb.mxu1 %v1432_v14  ;;  %v1641_v14 = vld [vmem:[#allocation6 + $0x1a4] sm:$0xf]  ;;  %v1369_v45 = vld [vmem:[#allocation6 + $0x208] sm:$0xf0]  ;;  %v1692_v52 = vld [vmem:[#allocation8 + $0x38] sm:$0xff] }
  0x54   :  { %776 = vmatpush.bf16.msrb.mxu2 %v1116_v15  ;;  %v1460_v15 = vor.u32 %v1675_v7, %v1457_v8  ;;  %v1669_v46 = vld [vmem:[#allocation6 + $0x284] sm:$0xf]  ;;  %v1433_v47 = vld [vmem:[#allocation6 + $0x288] sm:$0xf0]  ;;  %v1691_v53 = vld [vmem:[#allocation8 + $0x30] sm:$0xff] }
  0x55   :  { %789 = vmatpush.bf16.msrb.mxu3 %v1180_v20  ;;  %751 = vmatmul.bf16.vlgmr.msrb.gmra.mxu0 %v1903_v29  ;;  %v1673_v20 = vld [vmem:[#allocation6 + $0x2a4] sm:$0xf]  ;;  %v1436_v51 = vor.u32 %v1669_v46, %v1433_v47  ;;  %v1695_v13 = vld [vmem:[#allocation8 + $0x50] sm:$0xff] }
  0x56   :  { %795 = vmatpush.bf16.msra.mxu0 %v1300_v21  ;;  %764 = vmatmul.bf16.vlgmr.msrb.gmra.mxu1 %v1905_v33  ;;  %v1449_v21 = vld [vmem:[#allocation6 + $0x2a8] sm:$0xf0]  ;;  %v1689_v55 = vld [vmem:[#allocation8 + $0x20] sm:$0xff] }
  0x57   :  { %808 = vmatpush.bf16.msra.mxu1 %v1364_v23  ;;  %777 = vmatmul.bf16.vlgmr.msrb.gmra.mxu2 %v1891_v56  ;;  %v1465_v56 = vld [vmem:[#allocation6 + $0x2c8] sm:$0xf0]  ;;  %v1324_v23 = vor.u32 %v1641_v14, %v1321_v16  ;;  %v1697_v3 = vld [vmem:[#allocation8 + $0x60] sm:$0xff]  ;;  %v849_v16 = vstv %s1936_s3 }
  0x58   :  { %821 = vmatpush.bf16.msra.mxu2 %v1428_v24  ;;  %790 = vmatmul.bf16.vlgmr.msrb.gmra.mxu3 %v1894_v4  ;;  %v1404_v4 = vor.u32 %v1661_v57, %v1401_v58  ;;  %v1468_v1 = vor.u32 %v1677_v59, %v1465_v56  ;;  %v1388_v24 = vor.u32 %v1657_v18, %v1385_v19  ;;  %v1688_v57 = vld [vmem:[#allocation8 + $0x18] sm:$0xff]  ;;  %v1687_v58 = vld [vmem:[#allocation8 + $0x10] sm:$0xff]  ;;  %v1686_v56 = vld [vmem:[#allocation8 + $0x8] sm:$0xff] }
  0x59   :  { %834 = vmatpush.bf16.msra.mxu3 %v1492_v28  ;;  %v1452_v28 = vor.u32 %v1673_v20, %v1449_v21  ;;  %v1694_v20 = vld [vmem:[#allocation8 + $0x48] sm:$0xff] }
  0x5a   :  { %796 = vmatpush.bf16.msra.mxu0 %v1292_v36  ;;  %v1252_v36 = vor.u32 %v1623_v25, %v1249_v26 }
  0x5b   :  { %809 = vmatpush.bf16.msra.mxu1 %v1356_v37  ;;  %v1316_v37 = vor.u32 %v1639_v27, %v1313_v30  ;;  %v1693_v27 = vld [vmem:[#allocation8 + $0x40] sm:$0xff] }
  0x5c   :  { %822 = vmatpush.bf16.msra.mxu2 %v1420_v38  ;;  %v1380_v38 = vor.u32 %v1655_v31, %v1377_v32 }
  0x5d   :  { %835 = vmatpush.bf16.msra.mxu3 %v1484_v42  ;;  %v1444_v42 = vor.u32 %v1671_v34, %v1441_v35 }
  0x5e   :  { %797 = vmatpush.bf16.msra.mxu0 %v1284_v48  ;;  %v1244_v48 = vor.u32 %v1621_v39, %v1241_v40 }
  0x5f   :  { %810 = vmatpush.bf16.msra.mxu1 %v1348_v49  ;;  %v1308_v49 = vor.u32 %v1637_v41, %v1305_v43 }
  0x60   :  { %823 = vmatpush.bf16.msra.mxu2 %v1412_v50  ;;  %v1372_v50 = vor.u32 %v1653_v44, %v1369_v45 }
  0x61   :  { %836 = vmatpush.bf16.msra.mxu3 %v1476_v54  ;;  %v1690_v54 = vld [vmem:[#allocation8 + $0x28] sm:$0xff] }
  0x62   :  { %798 = vmatpush.bf16.msra.mxu0 %v1276_v60 }
  0x63   :  { %811 = vmatpush.bf16.msra.mxu1 %v1340_v61  ;;  %v1699_v61 = vld [vmem:[#allocation8 + $0x70] sm:$0xff] }
  0x64   :  { %824 = vmatpush.bf16.msra.mxu2 %v1404_v4 }
  0x65   :  { %837 = vmatpush.bf16.msra.mxu3 %v1468_v1  ;;  %v1698_v1 = vld [vmem:[#allocation8 + $0x68] sm:$0xff] }
  0x66   :  { %799 = vmatpush.bf16.msra.mxu0 %v1268_v9 }
  0x67   :  { %812 = vmatpush.bf16.msra.mxu1 %v1332_v10 }
  0x68   :  { %825 = vmatpush.bf16.msra.mxu2 %v1396_v11  ;;  %v1696_v11 = vld [vmem:[#allocation8 + $0x58] sm:$0xff] }
  0x69   :  { %838 = vmatpush.bf16.msra.mxu3 %v1460_v15 }
  0x6a   :  { %800 = vmatpush.bf16.msra.mxu0 %v1260_v22 }
  0x6b   :  { %813 = vmatpush.bf16.msra.mxu1 %v1324_v23 }
  0x6c   :  { %826 = vmatpush.bf16.msra.mxu2 %v1388_v24 }
  0x6d   :  { %839 = vmatpush.bf16.msra.mxu3 %v1452_v28 }
  0x6e   :  { %801 = vmatpush.bf16.msra.mxu0 %v1252_v36 }
  0x6f   :  { %814 = vmatpush.bf16.msra.mxu1 %v1316_v37 }
  0x70   :  { %827 = vmatpush.bf16.msra.mxu2 %v1380_v38 }
  0x71   :  { %840 = vmatpush.bf16.msra.mxu3 %v1444_v42 }
  0x72   :  { %802 = vmatpush.bf16.msra.mxu0 %v1244_v48 }
  0x73   :  { %815 = vmatpush.bf16.msra.mxu1 %v1308_v49 }
  0x74   :  { %828 = vmatpush.bf16.msra.mxu2 %v1372_v50  ;;  %v1708_v50 = vld [vmem:[#allocation9 + $0x38] sm:$0xff] }
  0x75   :  { %841 = vmatpush.bf16.msra.mxu3 %v1436_v51  ;;  %803 = vmatmul.bf16.vlgmr.msra.gmra.mxu0 %v1896_v5  ;;  %v1685_v5 = vld [vmem:[#allocation8] sm:$0xff]  ;;  %v1707_v51 = vld [vmem:[#allocation9 + $0x30] sm:$0xff] }
  0x76   :  { %988 = vmatpush.bf16.msrb.mxu0 %v1692_v52  ;;  %816 = vmatmul.bf16.vlgmr.msra.gmra.mxu1 %v1899_v17  ;;  %v205_v17 = vld [vmem:[%s1935_s2] sm:$0x3]  ;;  %v1706_v52 = vld [vmem:[#allocation9 + $0x28] sm:$0xff] }
  0x77   :  { %829 = vmatmul.bf16.vlgmr.msra.gmra.mxu2 %v1903_v29  ;;  %v207_v4 = vperm.slane %v205_v17, 0  ;;  %v208_v31 = vperm.slane %v205_v17, 1 }
  0x78   :  { %842 = vmatmul.bf16.vlgmr.msra.gmra.mxu3 %v1905_v33  ;;  %v1700_v33 = vld [vmem:[#allocation8 + $0x78] sm:$0xff]  ;;  %1087 = vmatpush.bf16.msrb.mxu2 %v1708_v50 }
  0x79   :  { %1001 = vmatpush.bf16.msrb.mxu1 %v1700_v33 }
  0x7a   :  { %989 = vmatpush.bf16.msrb.mxu0 %v1691_v53  ;;  %v1705_v53 = vld [vmem:[#allocation9 + $0x20] sm:$0xff] }
  0x7c   :  { %1088 = vmatpush.bf16.msrb.mxu2 %v1707_v51 }
  0x7d   :  { %1002 = vmatpush.bf16.msrb.mxu1 %v1699_v61 }
  0x7e   :  { %990 = vmatpush.bf16.msrb.mxu0 %v1690_v54  ;;  %v1704_v54 = vld [vmem:[#allocation9 + $0x18] sm:$0xff] }
  0x80   :  { %1089 = vmatpush.bf16.msrb.mxu2 %v1706_v52 }
  0x81   :  { %1003 = vmatpush.bf16.msrb.mxu1 %v1698_v1 }
  0x82   :  { %991 = vmatpush.bf16.msrb.mxu0 %v1689_v55  ;;  %v1703_v55 = vld [vmem:[#allocation9 + $0x10] sm:$0xff] }
  0x84   :  { %1090 = vmatpush.bf16.msrb.mxu2 %v1705_v53 }
  0x85   :  { %1004 = vmatpush.bf16.msrb.mxu1 %v1697_v3 }
  0x86   :  { %992 = vmatpush.bf16.msrb.mxu0 %v1688_v57 }
  0x88   :  { %1091 = vmatpush.bf16.msrb.mxu2 %v1704_v54 }
  0x89   :  { %1005 = vmatpush.bf16.msrb.mxu1 %v1696_v11 }
  0x8a   :  { %993 = vmatpush.bf16.msrb.mxu0 %v1687_v58  ;;  %v1702_v58 = vld [vmem:[#allocation9 + $0x8] sm:$0xff] }
  0x8c   :  { %1092 = vmatpush.bf16.msrb.mxu2 %v1703_v55 }
  0x8d   :  { %1006 = vmatpush.bf16.msrb.mxu1 %v1695_v13 }
  0x8e   :  { %994 = vmatpush.bf16.msrb.mxu0 %v1686_v56  ;;  %v1701_v56 = vld [vmem:[#allocation9] sm:$0xff] }
  0x90   :  { %1093 = vmatpush.bf16.msrb.mxu2 %v1702_v58 }
  0x91   :  { %1007 = vmatpush.bf16.msrb.mxu1 %v1694_v20 }
  0x92   :  { %995 = vmatpush.bf16.msrb.mxu0 %v1685_v5 }
  0x94   :  { %1094 = vmatpush.bf16.msrb.mxu2 %v1701_v56 }
  0x95   :  { %1008 = vmatpush.bf16.msrb.mxu1 %v1693_v27 }
  0xb2   :  { %v700_v59 = vpop.f32.mrf.mxu0 }
  0xb3   :  { %v713_v60 = vpop.f32.mrf.mxu1  ;;  %v701_v2 = vadd.f32 %v700_v59, %v207_v4 }
  0xb5   :  { %v714_v6 = vadd.f32 %v713_v60, %v701_v2  ;;  %v1717_v60 = vld [vmem:[%s1938_s5] ss:$0 sm:$0xff] }
  0xba   :  { %v702_v29 = vpop.f32.mrf.mxu0  ;;  %v726_v62 = vpop.f32.mrf.mxu2 }
  0xbb   :  { %v715_v63 = vpop.f32.mrf.mxu1  ;;  %v739_v0 = vpop.f32.mrf.mxu3  ;;  %v727_v9 = vadd.f32 %v726_v62, %v714_v6  ;;  %v1015_v29 = vstv %s1939_s6 }
  0xbd   :  { %v740_v10 = vadd.f32 %v739_v0, %v727_v9  ;;  %v1718_v0 = vld [vmem:[%s1941_s8] ss:$0 sm:$0xff] }
  0xc2   :  { %v728_v7 = vpop.f32.mrf.mxu2 }
  0xc3   :  { %v741_v8 = vpop.f32.mrf.mxu3 }
  0xd2   :  { %v752_v12 = vpop.f32.mrf.mxu0 }
  0xd3   :  { %v753_v14 = vadd.f32 %v752_v12, %v740_v10  ;;  %v765_v15 = vpop.f32.mrf.mxu1 }
  0xd5   :  { %v766_v18 = vadd.f32 %v765_v15, %v753_v14 }
  0xd7   :  { %vm847_vm0 = vcmp.ge.f32.partialorder %v766_v18, 0.0  ;;  %v850_v19 = vmul.f32 %v849_v16, %v766_v18 }
  0xd9   :  { %v852_v21 = vsel %vm847_vm0, %v766_v18, %v850_v19 }
  0xda   :  { %v778_v22 = vpop.f32.mrf.mxu2  ;;  %v854_v23 = vpack.c.bf16 %v852_v21, %v852_v21  ;;  %v754_v25 = vpop.f32.mrf.mxu0 }
  0xdb   :  { %v791_v24 = vpop.f32.mrf.mxu3  ;;  %v767_v26 = vpop.f32.mrf.mxu1  ;;  %v779_v32 = vadd.f32 %v778_v22, %v208_v31 }
  0xdc   :  { %996 = vmatmul.bf16.vlgmr.msrb.gmra.mxu0 %v854_v23 }
  0xdd   :  { %v792_v34 = vadd.f32 %v791_v24, %v779_v32 }
  0xe2   :  { %v780_v28 = vpop.f32.mrf.mxu2 }
  0xe3   :  { %v793_v30 = vpop.f32.mrf.mxu3 }
  0xf2   :  { %v804_v35 = vpop.f32.mrf.mxu0 }
  0xf3   :  { %v817_v36 = vpop.f32.mrf.mxu1  ;;  %v805_v37 = vadd.f32 %v804_v35, %v792_v34 }
  0xf5   :  { %v818_v38 = vadd.f32 %v817_v36, %v805_v37 }
  0xfa   :  { %v830_v39 = vpop.f32.mrf.mxu2  ;;  %v806_v42 = vpop.f32.mrf.mxu0 }
  0xfb   :  { %v831_v40 = vadd.f32 %v830_v39, %v818_v38  ;;  %v843_v41 = vpop.f32.mrf.mxu3  ;;  %v819_v43 = vpop.f32.mrf.mxu1 }
  0xfd   :  { %v844_v44 = vadd.f32 %v843_v41, %v831_v40 }
  0xff   :  { %vm848_vm1 = vcmp.ge.f32.partialorder %v844_v44, 0.0  ;;  %v851_v45 = vmul.f32 %v849_v16, %v844_v44 }
 0x101   :  { %v853_v46 = vsel %vm848_vm1, %v844_v44, %v851_v45 }
 0x102   :  { %v855_v47 = vpack.c.bf16 %v853_v46, %v853_v46  ;;  %v832_v48 = vpop.f32.mrf.mxu2 }
 0x103   :  { %v845_v49 = vpop.f32.mrf.mxu3 }
 0x104   :  { %1009 = vmatmul.bf16.vlgmr.msrb.gmra.mxu1 %v855_v47 }
 0x159   :  { %v997_v57 = vpop.f32.mrf.mxu0 }
 0x15a   :  { %v998_v5 = vadd.f32 %v1717_v60, %v997_v57 }
 0x161   :  { %v999_v59 = vpop.f32.mrf.mxu0 }
 0x181   :  { %v1010_v17 = vpop.f32.mrf.mxu1 }
 0x182   :  { %v1011_v33 = vadd.f32 %v1010_v17, %v998_v5 }
 0x184   :  { %vm1014_vm2 = vcmp.ge.f32.partialorder %v1011_v33, 0.0  ;;  %v1016_v61 = vmul.f32 %v1015_v29, %v1011_v33 }
 0x186   :  { %v1017_v4 = vsel %vm1014_vm2, %v1011_v33, %v1016_v61 }
 0x187   :  { %v1018_v62 = vpack.c.bf16 %v1017_v4, %v1017_v4 }
 0x189   :  { %v1012_v63 = vpop.f32.mrf.mxu1  ;;  %1095 = vmatmul.bf16.vlgmr.msrb.gmra.mxu2 %v1018_v62 }
 0x20c   :  { %v1096_v1 = vpop.f32.mrf.mxu2 }
 0x20d   :  { %v1097_v2 = vadd.f32 %v1718_v0, %v1096_v1 }
 0x20f   :  { %1101 = vst.msk [vmem:[%s1942_s9] sm:$0xff] %vm1100_vm3, %v1097_v2 }
 0x214   :  { %v1098_v3 = vpop.f32.mrf.mxu2 }
 0x215   :  { %1106 = vsyncpa [#allocation5], 1 }
 0x216   :  { %1107 = vsyncpa [#allocation7], 1 }
 0x217   :  { %1108 = vsyncpa [#allocation10], 1 }

</bundles_post_ra>
